<compile_context>
chip_gen: v7x
topology: tpu7x:2x2x1
jax: 0.10.0
libtpu: 0.0.40
codegen_flags: <defaults>
</compile_context>

<pallas_src>
import jax
import jax.numpy as jnp
from jax.experimental import pallas as pl
from jax.experimental.pallas import tpu as pltpu


# ----------------------------- kernels ------------------------------------ #

def _mask1d_kernel(value_ref, x_ref, s_ref, out_ref):
    v = value_ref[0]                      # SMEM scalar (f32)
    x = x_ref[...]
    s = s_ref[...]
    out_ref[...] = (x * s + v * (1.0 - s)).astype(out_ref.dtype)


def _mask1d_append_kernel(value_ref, x_ref, s_ref, out_ref):
    v = value_ref[0]                      # SMEM scalar (f32)
    x = x_ref[...]
    s = s_ref[...]
    feat = x.shape[-1]
    # out block is (tb, 2*feat): static-slice writes; lane-dense when feat % 128 == 0.
    out_ref[:, :feat] = (x * s + v * (1.0 - s)).astype(out_ref.dtype)
    out_ref[:, feat:] = s.astype(out_ref.dtype)


# --------------------------- tile selection -------------------------------- #

def _round_up(x, m):
    return ((x + m - 1) // m) * m


def _vmem_capacity_bytes():
    try:
        return int(pltpu.get_tpu_info().vmem_capacity_bytes)
    except Exception:
        return 64 * 1024 * 1024  # conservative fallback: v7x per-TensorCore VMEM


def _choose_tiles(batch, feat, itemsize, append):
    """Returns (tb, tf, vmem_limit_bytes)."""
    out_mult = 2 if append else 1
    capacity = _vmem_capacity_bytes()

    # Per-grid-step (single-buffered) budget.  BlockSpec double-buffers every
    # operand, so the live set is ~2x this; ~capacity/8 leaves ample headroom
    # on every generation (v5e/v6e: 16 MiB, v7x: 8 MiB).
    budget = max(capacity // 8, 1 << 20)

    # Sublane packing tile: f32 packs 8 rows per vreg, bf16 16, int8/fp8 32.
    sub = 8 * max(1, 4 // max(itemsize, 1))

    # Feature-axis tiling (append=False only): keep even a minimal-row strip
    # inside the budget when feat is very large.
    tf = feat
    if not append:
        min_strip = sub * feat * itemsize * (2 + out_mult)
        if min_strip > budget:
            tf = (budget // (sub * itemsize * (2 + out_mult)) // 128) * 128
            tf = int(max(128, min(tf, feat)))
    # TODO(synk): the append path keeps the full feature axis in a single block;
    # add feature tiling there too if feat*itemsize*4 ever approaches the budget.

    per_row = max(tf * itemsize * (2 + out_mult), 1)
    tb = budget // per_row
    if tb >= batch:
        tb = batch
    else:
        tb = max(sub, (tb // sub) * sub)

    # Guarantee >= 2 steps on the "parallel" batch axis when batch allows, so
    # v7x can shard tiles across both TensorCores (no-op on single-TC v5e/v6e).
    if pl.cdiv(batch, tb) < 2 and batch >= 2 * sub:
        tb = _round_up(pl.cdiv(batch, 2), sub)

    working = tb * per_row  # single-buffered per-step bytes
    vmem_limit = int(min(capacity, max(2 * working + (8 << 20), 32 << 20)))
    return tb, tf, vmem_limit


# ------------------------------ wrapper ------------------------------------ #

def mask_layer_1d(x, S, *, append=True, value=0.0):
    """Pallas implementation of MaskLayer1d.forward((x, S))."""
    assert x.ndim == 2 and x.shape == S.shape
    batch, feat = x.shape
    itemsize = jnp.dtype(x.dtype).itemsize
    tb, tf, vmem_limit = _choose_tiles(batch, feat, itemsize, append)

    # Fill value lives in SMEM -> changing it does not recompile the kernel.
    value_arr = jnp.full((1,), value, dtype=jnp.float32)
    value_spec = pl.BlockSpec(memory_space=pltpu.MemorySpace.SMEM)

    out_mult = 2 if append else 1
    cost = pl.CostEstimate(
        flops=3 * batch * feat,
        transcendentals=0,
        bytes_accessed=(2 + out_mult) * batch * feat * itemsize,
    )

    if append:
        grid = (pl.cdiv(batch, tb),)
        return pl.pallas_call(
            _mask1d_append_kernel,
            out_shape=jax.ShapeDtypeStruct((batch, 2 * feat), x.dtype),
            grid_spec=pl.GridSpec(
                grid=grid,
                in_specs=[
                    value_spec,
                    pl.BlockSpec((tb, feat), lambda i: (i, 0)),
                    pl.BlockSpec((tb, feat), lambda i: (i, 0)),
                ],
                out_specs=pl.BlockSpec((tb, 2 * feat), lambda i: (i, 0)),
            ),
            compiler_params=pltpu.CompilerParams(
                dimension_semantics=("parallel",),
                vmem_limit_bytes=vmem_limit,
            ),
            cost_estimate=cost,
        )(value_arr, x, S)
    else:
        grid = (pl.cdiv(batch, tb), pl.cdiv(feat, tf))
        return pl.pallas_call(
            _mask1d_kernel,
            out_shape=jax.ShapeDtypeStruct((batch, feat), x.dtype),
            grid_spec=pl.GridSpec(
                grid=grid,
                in_specs=[
                    value_spec,
                    pl.BlockSpec((tb, tf), lambda i, j: (i, j)),
                    pl.BlockSpec((tb, tf), lambda i, j: (i, j)),
                ],
                out_specs=pl.BlockSpec((tb, tf), lambda i, j: (i, j)),
            ),
            compiler_params=pltpu.CompilerParams(
                dimension_semantics=("parallel", "parallel"),
                vmem_limit_bytes=vmem_limit,
            ),
            cost_estimate=cost,
        )(value_arr, x, S)


# ------------------------------- demo -------------------------------------- #

if __name__ == "__main__":
    key = jax.random.PRNGKey(0)
    ok = True

    for (batch, feat) in [(8, 32), (16, 256)]:
        kx, ks, key = jax.random.split(key, 3)
        x = jax.random.normal(kx, (batch, feat), dtype=jnp.float32)
        S = (jax.random.uniform(ks, (batch, feat)) > 0.5).astype(jnp.float32)
        value = 0.5

        ref_masked = x * S + value * (1.0 - S)
        ref_append = jnp.concatenate([ref_masked, S], axis=1)

        out_append = jax.block_until_ready(
            mask_layer_1d(x, S, append=True, value=value))
        ok &= out_append.shape == ref_append.shape
        ok &= bool(jnp.allclose(out_append, ref_append, atol=1e-6))

        out_plain = jax.block_until_ready(
            mask_layer_1d(x, S, append=False, value=value))
        ok &= out_plain.shape == ref_masked.shape
        ok &= bool(jnp.allclose(out_plain, ref_masked, atol=1e-6))

    assert ok, "MaskLayer1d Pallas kernel mismatch vs reference"
    print("KERNEL_OK")
</pallas_src>

<mosaic_0001>
module attributes {stable_mosaic.version = 11 : i64} {
  func.func @_mask1d_append_kernel(%arg0: i32, %arg1: memref<1xf32, #tpu.memory_space<smem>>, %arg2: memref<8x32xf32, #tpu.memory_space<vmem>>, %arg3: memref<8x32xf32, #tpu.memory_space<vmem>>, %arg4: memref<8x64xf32, #tpu.memory_space<vmem>>) attributes {dimension_semantics = [#tpu.dimension_semantics<parallel>], iteration_bounds = array<i64: 1>, scalar_prefetch = 0 : i64, scratch_operands = 0 : i64, tpu.core_type = #tpu.core_type<tc>, window_params = [{transform_indices = @transform_0, window_bounds = array<i64: 1>}, {transform_indices = @transform_1, window_bounds = array<i64: 8, 32>}, {transform_indices = @transform_2, window_bounds = array<i64: 8, 32>}, {transform_indices = @transform_3, window_bounds = array<i64: 8, 64>}]} {
    %c0 = arith.constant 0 : index
    %0 = memref.load %arg1[%c0] : memref<1xf32, #tpu.memory_space<smem>>
    %c0_0 = arith.constant 0 : index
    %c0_1 = arith.constant 0 : index
    %1 = vector.load %arg2[%c0_0, %c0_1] : memref<8x32xf32, #tpu.memory_space<vmem>>, vector<8x32xf32>
    %c0_2 = arith.constant 0 : index
    %c0_3 = arith.constant 0 : index
    %2 = vector.load %arg3[%c0_2, %c0_3] : memref<8x32xf32, #tpu.memory_space<vmem>>, vector<8x32xf32>
    %3 = arith.mulf %1, %2 : vector<8x32xf32>
    %cst = arith.constant 1.000000e+00 : f32
    %4 = vector.broadcast %cst : f32 to vector<8x32xf32>
    %5 = arith.subf %4, %2 : vector<8x32xf32>
    %6 = vector.broadcast %0 : f32 to vector<8x32xf32>
    %7 = arith.mulf %6, %5 : vector<8x32xf32>
    %8 = arith.addf %3, %7 : vector<8x32xf32>
    %c0_4 = arith.constant 0 : index
    %c0_5 = arith.constant 0 : index
    %9 = vector.load %arg4[%c0_4, %c0_5] : memref<8x64xf32, #tpu.memory_space<vmem>>, vector<8x32xf32>
    tpu.vector_store %arg4[%c0_4, %c0_5], %8 {strides = array<i32>} : memref<8x64xf32, #tpu.memory_space<vmem>>, vector<8x32xf32>,
    %c0_6 = arith.constant 0 : index
    %c32 = arith.constant 32 : index
    %10 = vector.load %arg4[%c0_6, %c32] : memref<8x64xf32, #tpu.memory_space<vmem>>, vector<8x32xf32>
    tpu.vector_store %arg4[%c0_6, %c32], %2 {strides = array<i32>} : memref<8x64xf32, #tpu.memory_space<vmem>>, vector<8x32xf32>,
    return
  }
  func.func @transform_0(%arg0: i32) -> i32 {
    %c0_i32 = arith.constant 0 : i32
    %c0_i32_0 = arith.constant 0 : i32
    return %c0_i32 : i32
  }
  func.func @transform_1(%arg0: i32) -> (i32, i32) {
    %c0_i32 = arith.constant 0 : i32
    %c0_i32_0 = arith.constant 0 : i32
    return %arg0, %c0_i32 : i32, i32
  }
  func.func @transform_2(%arg0: i32) -> (i32, i32) {
    %c0_i32 = arith.constant 0 : i32
    %c0_i32_0 = arith.constant 0 : i32
    return %arg0, %c0_i32 : i32, i32
  }
  func.func @transform_3(%arg0: i32) -> (i32, i32) {
    %c0_i32 = arith.constant 0 : i32
    %c0_i32_0 = arith.constant 0 : i32
    return %arg0, %c0_i32 : i32, i32
  }
}

</mosaic_0001>

<bundles_post_ra>
// kernel: tpu_custom_call.1
= control target key start
LH: loop header
LB: loop body
LE: loop exit
PB: predicated region body
PF: predicated region fallthrough
CT: control target
= control target key end

     0   :  { %9 = vsyncpa [#allocation4], 0  ;;  %s211_s0 = inlined_call_operand.<no memory space> [shape: f32[1], index: 0, kind: input, shape index: {}]   ;;  %s212_s1 = inlined_call_operand.hbm [shape: f32[8,32], index: 1, kind: input, shape index: {}]   ;;  %s213_s2 = inlined_call_operand.hbm [shape: f32[8,32], index: 2, kind: input, shape index: {}]   ;;  %s214_s3 = inlined_call_operand.hbm [shape: f32[8,64], index: 3, kind: output, shape index: {}]  }
   0x1   :  { %10 = vsyncpa [#allocation7], 0 }
   0x2   :  { %11 = vsyncpa [#allocation5], 0  ;;  %s148_s12 = smov [#allocation3]   ;;  %s149_s14 = smov [#allocation6]  }
   0x3   :  { %s20_s13 = sshll.u32 %s148_s12, 4  ;;  %s30_s15 = sshll.u32 %s149_s14, 4  ;;  %s21_s13 = int_to_ptr.vmem [resolvable:$true] %s20_s13  ;;  %s31_s15 = int_to_ptr.vmem [resolvable:$true] %s30_s15 }
   0x4   :  { %s76_s18 = scalar_lea.hbm %s212_s1, 128 }
   0x5   :  { %p77_p0 = scmp.ne.s32.totalorder %s212_s1, %s76_s18  ;;  %p80_p1 = scmp.lt.u32.totalorder %s76_s18, %s212_s1 }
   0x7   :  { %p82_p2 = pnand %p80_p1, %p77_p0 }
   0x9   :  { %85 = shalt.err (!%p82_p2)
}
   0xa   :  { %s86_s23 = scalar_lea.vmem %s21_s13, 128  ;;  %p91_p4 = scmp.lt.s32.totalorder %s21_s13, %s21_s13 }
   0xb   :  { %p87_p3 = scmp.ne.s32.totalorder %s21_s13, %s86_s23  ;;  %p92_p5 = scmp.lt.s32.totalorder %s86_s23, %s86_s23 }
   0xd   :  { %p93_p6 = por %p92_p5, %p91_p4 }
   0xf   :  { %p94_p7 = pnand %p93_p6, %p87_p3 }
  0x11   :  { %97 = shalt.err (!%p94_p7)
}
  0x12   :  { %23 = dma.hbm_to_vmem [thread:$0]  %s212_s1, 128, %s21_s13, [#allocation4]  }
  0x13   :  { %s98_s28 = scalar_lea.hbm %s213_s2, 128 }
  0x14   :  { %p99_p8 = scmp.ne.s32.totalorder %s213_s2, %s98_s28  ;;  %p102_p9 = scmp.lt.u32.totalorder %s98_s28, %s213_s2 }
  0x16   :  { %p104_p10 = pnand %p102_p9, %p99_p8 }
  0x18   :  { %107 = shalt.err (!%p104_p10)
}
  0x19   :  { %s108_s6 = scalar_lea.vmem %s31_s15, 128  ;;  %p113_p12 = scmp.lt.s32.totalorder %s31_s15, %s31_s15 }
  0x1a   :  { %p109_p11 = scmp.ne.s32.totalorder %s31_s15, %s108_s6  ;;  %p114_p13 = scmp.lt.s32.totalorder %s108_s6, %s108_s6 }
  0x1c   :  { %p115_p0 = por %p114_p13, %p113_p12 }
  0x1e   :  { %p116_p1 = pnand %p115_p0, %p109_p11 }
  0x20   :  { %119 = shalt.err (!%p116_p1)
}
  0x21   :  { %33 = dma.hbm_to_vmem [thread:$0]  %s213_s2, 128, %s31_s15, [#allocation7]  }
  0x22   :  { %142 = dma.done.wait [#allocation4], 128  }
  0x23   :  { %143 = vsyncadd [#allocation4], 4294967168 }
  0x24   :  { %144 = dma.done.wait [#allocation7], 128  }
  0x25   :  { %145 = vsyncadd [#allocation7], 4294967168  ;;  %v41_v0 = vld [vmem:[#allocation3] sm:$0xff]  ;;  %v42_v1 = vld [vmem:[#allocation6] sm:$0xff]  ;;  %v45_v2 = vstv %s211_s0  ;;  %s150_s10 = smov 32   ;;  %vm48_vm0 = vcmask 261120  }
  0x26   :  { %v43_v3 = vmul.f32 %v42_v1, %v41_v0  ;;  %v44_v4 = vsub.f32 1.0, %v42_v1  ;;  %51 = vrot.lane.b32.xlu0 %v42_v1, %s150_s10  ;;  %s151_s11 = smov [#allocation8]   ;;  %vm54_vm1 = vcmask 523520  }
  0x27   :  { %s62_s2 = sshll.u32 %s151_s11, 4  ;;  %s63_s2 = int_to_ptr.vmem [resolvable:$true] %s62_s2 }
  0x28   :  { %v46_v5 = vmul.f32 %v45_v2, %v44_v4  ;;  %s120_s12 = scalar_lea.vmem %s63_s2, 128  ;;  %p125_p3 = scmp.lt.s32.totalorder %s63_s2, %s63_s2 }
  0x29   :  { %p121_p2 = scmp.ne.s32.totalorder %s63_s2, %s120_s12  ;;  %p126_p4 = scmp.lt.s32.totalorder %s120_s12, %s120_s12 }
  0x2a   :  { %v47_v6 = vadd.f32 %v46_v5, %v43_v3 }
  0x2b   :  { %p127_p5 = por %p126_p4, %p125_p3 }
  0x2c   :  { %49 = vst.msk [vmem:[#allocation8] sm:$0xff] %vm48_vm0, %v47_v6 }
  0x2d   :  { %p128_p6 = pnand %p127_p5, %p121_p2 }
  0x98   :  { %v52_v7 = vpop.permute.xlu0 %51 }
  0x99   :  { %55 = vst.msk [vmem:[#allocation8] sm:$0xff] %vm54_vm1, %v52_v7 }
  0x9a   :  { %131 = shalt.err (!%p128_p6)
}
  0x9b   :  { %s132_s14 = scalar_lea.hbm %s214_s3, 128 }
  0x9c   :  { %p133_p7 = scmp.ne.s32.totalorder %s214_s3, %s132_s14  ;;  %p136_p8 = scmp.lt.u32.totalorder %s132_s14, %s214_s3 }
  0x9e   :  { %p138_p9 = pnand %p136_p8, %p133_p7 }
  0xa0   :  { %141 = shalt.err (!%p138_p9)
}
  0xa1   :  { %65 = dma.vmem_to_hbm [thread:$0]  %s63_s2, 128, %s214_s3, [#allocation5]  }
  0xa2   :  { %146 = dma.done.wait [#allocation5], 128  }
  0xa3   :  { %147 = vsyncadd [#allocation5], 4294967168 }
  0xa4   :  { %69 = vsyncpa [#allocation4], 1 }
  0xa5   :  { %70 = vsyncpa [#allocation7], 1 }
  0xa6   :  { %71 = vsyncpa [#allocation5], 1 }

</bundles_post_ra>
